<compile_context>
chip_gen: v7x
topology: tpu7x:2x2x1
jax: 0.10.0
libtpu: 0.0.40
codegen_flags: <defaults>
</compile_context>

<pallas_src>
import functools

import jax
import jax.numpy as jnp
from jax.experimental import pallas as pl
from jax.experimental.pallas import tpu as pltpu

_LANE = 128
_SUBLANE = 8


def _round_up(a, b):
    return ((a + b - 1) // b) * b


def _sublane_multiple(itemsize):
    """Packed sublane tile for the dtype: f32 -> 8, bf16 -> 16, int8/fp8 -> 32."""
    return max(_SUBLANE, (4 // max(1, itemsize)) * _SUBLANE)


def _vmem_limit_bytes():
    """Per-generation scoped-VMEM request (v5e/v6e 128 MiB phys, v7x 64 MiB)."""
    phys = None
    try:
        info = pltpu.get_tpu_info()
        for name in ("vmem_capacity_bytes", "vmem_size_bytes", "vmem_bytes"):
            v = getattr(info, name, None)
            if v:
                phys = int(v)
                break
    except Exception:
        phys = None
    if not phys:
        phys = 64 * 1024 * 1024          # conservative: smallest (v7x) physical VMEM
    return min(phys * 3 // 4, 96 * 1024 * 1024)


def _pick_tile_n(n, d, itemsize, *, vmem_limit, n_buffers=2):
    """Largest batch tile whose double-buffered, lane-padded window fits VMEM."""
    d_pad = _round_up(d, _LANE)                    # lanes are padded in VMEM
    row_bytes = d_pad * itemsize                   # per row, per buffer
    # Reserve ~2 MiB for f32 chunk temporaries / accumulators / output blocks.
    budget = max(row_bytes * _SUBLANE, vmem_limit * 3 // 4 - (2 << 20))
    # Cap per-buffer blocks lower on 64-MiB-VMEM parts (v7x) than on v5e/v6e.
    per_buffer_cap = (6 << 20) if vmem_limit <= (48 << 20) else (12 << 20)
    per_buffer = min(per_buffer_cap, max(row_bytes, budget // n_buffers))
    rows = max(_SUBLANE, per_buffer // row_bytes)
    sub = _sublane_multiple(itemsize)
    rows = max(sub, (rows // sub) * sub)
    rows = min(rows, _round_up(max(n, 1), sub))    # never much larger than N
    return rows


def _pick_chunk_rows(tile_n, d, sub):
    """Rows per in-kernel compute chunk: keeps live f32 values ~<= 64 KiB."""
    d_pad = _round_up(d, _LANE)
    rows = max(sub, (64 * 1024) // (d_pad * 4))
    rows = max(sub, (rows // sub) * sub)
    rows = min(rows, tile_n)
    while tile_n % rows != 0:                      # chunk must divide the tile
        rows -= sub
    return max(sub, rows)


def _make_x_spec(block_shape, index_map, deep):
    """x BlockSpec; deepen the input pipeline to 3 buffers for small blocks."""
    if deep and hasattr(pl, "Buffered"):
        try:
            return pl.BlockSpec(block_shape, index_map, pipeline_mode=pl.Buffered(3))
        except Exception:
            pass
    return pl.BlockSpec(block_shape, index_map)


def _svdd_partial_kernel(x_ref, c_ref, part_ref, *, n_total, chunk, mask_tail):
    """One grid step: fold this tile's squared distances into an (8, p) partial."""
    tile_n, d = x_ref.shape
    n_chunks = tile_n // chunk
    small_d = d <= _LANE
    c = c_ref[...]                                           # (1, d) f32
    base = pl.program_id(0) * tile_n

    def tile_sum(masked):
        def body(j, acc):
            r0 = pl.multiple_of(j * chunk, chunk)
            xs = x_ref[pl.ds(r0, chunk), :].astype(jnp.float32)   # f32 upcast in VMEM
            diff = xs - c
            sq = diff * diff
            if masked:
                row = base + r0 + jax.lax.broadcasted_iota(jnp.int32, sq.shape, 0)
                sq = jnp.where(row < n_total, sq, 0.0)
            # Fold rows into the 8 sublanes: pure VPU adds, no cross-lane work.
            fold = jnp.sum(sq.reshape(chunk // _SUBLANE, _SUBLANE, d), axis=0)
            if not small_d:
                # Keep the accumulator tiny for wide D (one small XLU reduce/chunk).
                fold = jnp.sum(fold, axis=1, keepdims=True)
            return acc + fold

        init = jnp.zeros((_SUBLANE, d if small_d else 1), jnp.float32)
        return jax.lax.fori_loop(0, n_chunks, body, init)[None]   # (1, 8, p)

    if not mask_tail:
        part_ref[...] = tile_sum(False)
    else:
        last = pl.num_programs(0) - 1

        @pl.when(pl.program_id(0) != last)          # hot path: no mask arithmetic
        def _():
            part_ref[...] = tile_sum(False)

        @pl.when(pl.program_id(0) == last)          # ragged tail only
        def _():
            part_ref[...] = tile_sum(True)


def _svdd_dist_kernel(x_ref, c_ref, dist_ref, *, chunk):
    """One grid step: per-sample squared distances for this batch tile."""
    tile_n, _ = x_ref.shape
    c = c_ref[...]

    def body(j, carry):
        r0 = pl.multiple_of(j * chunk, chunk)
        xs = x_ref[pl.ds(r0, chunk), :].astype(jnp.float32)
        diff = xs - c
        dist_ref[pl.ds(r0, chunk), :] = jnp.sum(diff * diff, axis=1, keepdims=True)
        return carry

    jax.lax.fori_loop(0, tile_n // chunk, body, 0)


def deep_svdd_loss(x, c, reduction="mean", *, tile_n=None):
    """x: (N, D), c: (D,). Returns scalar for 'mean'/'sum', else (N,) distances."""
    n, d = x.shape
    # Keep the center in f32 (do NOT quantize it to x.dtype); keep x narrow.
    c2 = jnp.asarray(c, jnp.float32).reshape(1, d)

    itemsize = jnp.dtype(x.dtype).itemsize
    sub = _sublane_multiple(itemsize)
    vmem_limit = _vmem_limit_bytes()

    if tile_n is None:
        tile_n = _pick_tile_n(n, d, itemsize, vmem_limit=vmem_limit)
        # Keep at least 2 grid steps so the "parallel" axis can feed both
        # TensorCores on megacore parts (v7x); grid == 1 leaves a core idle.
        if tile_n >= n and n > sub:
            tile_n = max(sub, _round_up(pl.cdiv(n, 2), sub))
    else:
        tile_n = max(sub, (int(tile_n) // sub) * sub)

    grid = pl.cdiv(n, tile_n)
    mask_tail = (n % tile_n) != 0
    chunk = _pick_chunk_rows(tile_n, d, sub)

    d_pad = _round_up(d, _LANE)
    block_bytes = tile_n * d_pad * itemsize
    # Small blocks expose DMA latency as per-step bubbles: deepen the pipeline.
    deep = grid >= 3 and block_bytes <= (2 << 20)

    x_spec = _make_x_spec((tile_n, d), lambda i: (i, 0), deep)
    c_spec = pl.BlockSpec((1, d), lambda i: (0, 0))
    cparams = pltpu.CompilerParams(
        dimension_semantics=("parallel",),
        vmem_limit_bytes=vmem_limit,
    )

    if reduction in ("mean", "sum"):
        p_out = d if d <= _LANE else 1
        kernel = functools.partial(
            _svdd_partial_kernel, n_total=n, chunk=chunk, mask_tail=mask_tail)
        partials = pl.pallas_call(
            kernel,
            out_shape=jax.ShapeDtypeStruct((grid, _SUBLANE, p_out), jnp.float32),
            grid=(grid,),
            in_specs=[x_spec, c_spec],
            out_specs=pl.BlockSpec((1, _SUBLANE, p_out), lambda i: (i, 0, 0)),
            compiler_params=cparams,
        )(x, c2)
        total = jnp.sum(partials)
        if reduction == "mean":
            return total / jnp.float32(n)
        return total

    # reduction == 'none' (or anything else): per-sample distances
    kernel = functools.partial(_svdd_dist_kernel, chunk=chunk)
    dist = pl.pallas_call(
        kernel,
        out_shape=jax.ShapeDtypeStruct((n, 1), jnp.float32),
        grid=(grid,),
        in_specs=[x_spec, c_spec],
        out_specs=pl.BlockSpec((tile_n, 1), lambda i: (i, 0)),
        compiler_params=cparams,
    )(x, c2)
    return dist[:, 0]


if __name__ == "__main__":
    key = jax.random.PRNGKey(0)
    kx, kc, kx2, kc2, kx3, kc3 = jax.random.split(key, 6)

    # Primary small case consistent with the module: x (N, D) features, c (D,)
    N, D = 24, 32
    x = jax.random.normal(kx, (N, D), dtype=jnp.float32)
    c = jax.random.normal(kc, (D,), dtype=jnp.float32)

    dist_ref = jnp.sum((x - c[None, :]) ** 2, axis=1)
    ref_mean, ref_sum = jnp.mean(dist_ref), jnp.sum(dist_ref)

    out_mean = jax.block_until_ready(deep_svdd_loss(x, c, reduction="mean"))
    out_sum = jax.block_until_ready(deep_svdd_loss(x, c, reduction="sum"))
    out_none = jax.block_until_ready(deep_svdd_loss(x, c, reduction="none"))
    assert jnp.allclose(out_mean, ref_mean, rtol=1e-5, atol=1e-5)
    assert jnp.allclose(out_sum, ref_sum, rtol=1e-5, atol=1e-5)
    assert jnp.allclose(out_none, dist_ref, rtol=1e-5, atol=1e-5)

    # Explicit small tile (grid=3): exercises the deep-buffer (Buffered(3)) path.
    out_mean_t = jax.block_until_ready(deep_svdd_loss(x, c, "mean", tile_n=8))
    assert jnp.allclose(out_mean_t, ref_mean, rtol=1e-5, atol=1e-5)

    # Ragged tail: N not a multiple of tile_n (masking gated to the last tile).
    N2 = 20
    x2 = x[:N2]
    dist2 = jnp.sum((x2 - c[None, :]) ** 2, axis=1)
    out_sum2 = jax.block_until_ready(deep_svdd_loss(x2, c, "sum", tile_n=8))
    out_none2 = jax.block_until_ready(deep_svdd_loss(x2, c, "none", tile_n=8))
    assert jnp.allclose(out_sum2, jnp.sum(dist2), rtol=1e-5, atol=1e-5)
    assert jnp.allclose(out_none2, dist2, rtol=1e-5, atol=1e-5)

    # Wide-feature case (D > 128): (8,1) partials + ragged auto-tiled grid.
    N3, D3 = 300, 160
    x3 = jax.random.normal(kx2, (N3, D3), dtype=jnp.float32)
    c3 = jax.random.normal(kc2, (D3,), dtype=jnp.float32)
    dist3 = jnp.sum((x3 - c3[None, :]) ** 2, axis=1)
    out_mean3 = jax.block_until_ready(deep_svdd_loss(x3, c3, "mean"))
    out_none3 = jax.block_until_ready(deep_svdd_loss(x3, c3, "none"))
    assert jnp.allclose(out_mean3, jnp.mean(dist3), rtol=1e-4, atol=1e-4)
    assert jnp.allclose(out_none3, dist3, rtol=1e-4, atol=1e-4)

    # bf16 inputs: 16-row sublane rounding, f32 upcast inside the kernel.
    N4, D4 = 64, 48
    x4 = jax.random.normal(kx3, (N4, D4), dtype=jnp.float32).astype(jnp.bfloat16)
    c4 = jax.random.normal(kc3, (D4,), dtype=jnp.float32)
    dist4 = jnp.sum((x4.astype(jnp.float32) - c4[None, :]) ** 2, axis=1)
    out_sum4 = jax.block_until_ready(deep_svdd_loss(x4, c4, "sum"))
    assert jnp.allclose(out_sum4, jnp.sum(dist4), rtol=1e-4, atol=1e-3)

    print("KERNEL_OK")
</pallas_src>

<mosaic_0001>
module attributes {stable_mosaic.version = 11 : i64} {
  func.func @_svdd_partial_kernel(%arg0: i32, %arg1: memref<16x32xf32, #tpu.memory_space<vmem>>, %arg2: memref<1x32xf32, #tpu.memory_space<vmem>>, %arg3: memref<1x8x32xf32, #tpu.memory_space<vmem>>) attributes {dimension_semantics = [#tpu.dimension_semantics<parallel>], iteration_bounds = array<i64: 2>, scalar_prefetch = 0 : i64, scratch_operands = 0 : i64, tpu.core_type = #tpu.core_type<tc>, window_params = [{transform_indices = @transform_0, window_bounds = array<i64: 16, 32>}, {pipeline_mode = #tpu.pipeline_mode<synchronous>, transform_indices = @transform_1, window_bounds = array<i64: 1, 32>}, {transform_indices = @transform_2, window_bounds = array<i64: 1, 8, 32>}]} {
    %c0 = arith.constant 0 : index
    %c0_0 = arith.constant 0 : index
    %0 = vector.load %arg2[%c0, %c0_0] : memref<1x32xf32, #tpu.memory_space<vmem>>, vector<1x32xf32>
    %c16_i32 = arith.constant 16 : i32
    %1 = arith.muli %arg0, %c16_i32 : i32
    %c1_i32 = arith.constant 1 : i32
    %2 = arith.cmpi ne, %arg0, %c1_i32 : i32
    %3 = arith.extui %2 : i1 to i32
    %c0_i32 = arith.constant 0 : i32
    %4 = arith.cmpi ne, %3, %c0_i32 : i32
    scf.if %4 {
      %cst = arith.constant 0.000000e+00 : f32
      %8 = vector.broadcast %cst : f32 to vector<8x32xf32>
      %c0_i32_3 = arith.constant 0 : i32
      %c16_i32_4 = arith.constant 16 : i32
      %9 = arith.muli %c0_i32_3, %c16_i32_4 : i32
      %10 = tpu.assume_multiple %9, 16 : i32
      %11 = arith.index_cast %10 : i32 to index
      %c0_5 = arith.constant 0 : index
      %12 = vector.load %arg1[%11, %c0_5] : memref<16x32xf32, #tpu.memory_space<vmem>>, vector<16x32xf32>
      %13 = vector.broadcast %0 : vector<1x32xf32> to vector<16x32xf32>
      %14 = arith.subf %12, %13 : vector<16x32xf32>
      %15 = arith.mulf %14, %14 : vector<16x32xf32>
      %16 = vector.shape_cast %15 : vector<16x32xf32> to vector<2x8x32xf32>
      %cst_6 = arith.constant dense<0.000000e+00> : vector<8x32xf32>
      %17 = vector.multi_reduction <add>, %16, %cst_6 [0] : vector<2x8x32xf32> to vector<8x32xf32>
      %18 = arith.addf %8, %17 : vector<8x32xf32>
      %c1_i32_7 = arith.constant 1 : i32
      %19 = vector.shape_cast %18 : vector<8x32xf32> to vector<1x8x32xf32>
      %c0_8 = arith.constant 0 : index
      %c0_9 = arith.constant 0 : index
      %c0_10 = arith.constant 0 : index
      %20 = vector.load %arg3[%c0_8, %c0_9, %c0_10] : memref<1x8x32xf32, #tpu.memory_space<vmem>>, vector<1x8x32xf32>
      tpu.vector_store %arg3[%c0_8, %c0_9, %c0_10], %19 {strides = array<i32>} : memref<1x8x32xf32, #tpu.memory_space<vmem>>, vector<1x8x32xf32>,
    } else {
    }
    %c1_i32_1 = arith.constant 1 : i32
    %5 = arith.cmpi eq, %arg0, %c1_i32_1 : i32
    %6 = arith.extui %5 : i1 to i32
    %c0_i32_2 = arith.constant 0 : i32
    %7 = arith.cmpi ne, %6, %c0_i32_2 : i32
    scf.if %7 {
      %cst = arith.constant 0.000000e+00 : f32
      %8 = vector.broadcast %cst : f32 to vector<8x32xf32>
      %c0_i32_3 = arith.constant 0 : i32
      %c16_i32_4 = arith.constant 16 : i32
      %9 = arith.muli %c0_i32_3, %c16_i32_4 : i32
      %10 = tpu.assume_multiple %9, 16 : i32
      %11 = arith.index_cast %10 : i32 to index
      %c0_5 = arith.constant 0 : index
      %12 = vector.load %arg1[%11, %c0_5] : memref<16x32xf32, #tpu.memory_space<vmem>>, vector<16x32xf32>
      %13 = vector.broadcast %0 : vector<1x32xf32> to vector<16x32xf32>
      %14 = arith.subf %12, %13 : vector<16x32xf32>
      %15 = arith.mulf %14, %14 : vector<16x32xf32>
      %16 = arith.addi %1, %10 : i32
      %17 = tpu.iota {dimensions = array<i32: 0>} : vector<16x32xi32>
      %18 = vector.broadcast %16 : i32 to vector<16x32xi32>
      %19 = arith.addi %18, %17 : vector<16x32xi32>
      %c24_i32 = arith.constant 24 : i32
      %20 = vector.broadcast %c24_i32 : i32 to vector<16x32xi32>
      %21 = arith.cmpi slt, %19, %20 : vector<16x32xi32>
      %cst_6 = arith.constant 0.000000e+00 : f32
      %22 = vector.broadcast %cst_6 : f32 to vector<16x32xf32>
      %23 = arith.select %21, %15, %22 : vector<16x32xi1>, vector<16x32xf32>
      %24 = vector.shape_cast %23 : vector<16x32xf32> to vector<2x8x32xf32>
      %cst_7 = arith.constant dense<0.000000e+00> : vector<8x32xf32>
      %25 = vector.multi_reduction <add>, %24, %cst_7 [0] : vector<2x8x32xf32> to vector<8x32xf32>
      %26 = arith.addf %8, %25 : vector<8x32xf32>
      %c1_i32_8 = arith.constant 1 : i32
      %27 = vector.shape_cast %26 : vector<8x32xf32> to vector<1x8x32xf32>
      %c0_9 = arith.constant 0 : index
      %c0_10 = arith.constant 0 : index
      %c0_11 = arith.constant 0 : index
      %28 = vector.load %arg3[%c0_9, %c0_10, %c0_11] : memref<1x8x32xf32, #tpu.memory_space<vmem>>, vector<1x8x32xf32>
      tpu.vector_store %arg3[%c0_9, %c0_10, %c0_11], %27 {strides = array<i32>} : memref<1x8x32xf32, #tpu.memory_space<vmem>>, vector<1x8x32xf32>,
    } else {
    }
    return
  }
  func.func @transform_0(%arg0: i32) -> (i32, i32) {
    %c0_i32 = arith.constant 0 : i32
    %c0_i32_0 = arith.constant 0 : i32
    return %arg0, %c0_i32 : i32, i32
  }
  func.func @transform_1(%arg0: i32) -> (i32, i32) {
    %c0_i32 = arith.constant 0 : i32
    %c0_i32_0 = arith.constant 0 : i32
    %c0_i32_1 = arith.constant 0 : i32
    return %c0_i32, %c0_i32_0 : i32, i32
  }
  func.func @transform_2(%arg0: i32) -> (i32, i32, i32) {
    %c0_i32 = arith.constant 0 : i32
    %c0_i32_0 = arith.constant 0 : i32
    %c0_i32_1 = arith.constant 0 : i32
    return %arg0, %c0_i32, %c0_i32_0 : i32, i32, i32
  }
}

</mosaic_0001>

<bundles_post_ra>
// kernel: tpu_custom_call.1
= control target key start
LH: loop header
LB: loop body
LE: loop exit
PB: predicated region body
PF: predicated region fallthrough
CT: control target
= control target key end

     0   :  { %7 = vsyncpa [#allocation3], 0  ;;  %s663_s0 = inlined_call_operand.hbm [shape: f32[24,32], index: 0, kind: input, shape index: {}]   ;;  %s664_s1 = inlined_call_operand.vmem [shape: f32[1,32], index: 1, kind: input, shape index: {}]   ;;  %s665_s2 = inlined_call_operand.hbm [shape: f32[2,8,32], index: 2, kind: output, shape index: {}]  }
   0x1   :  { %9 = vsyncpa [#allocation3 + $0x1], 0 }
   0x2   :  { %10 = vsyncpa [#allocation4], 0 }
   0x3   :  { %12 = vsyncpa [#allocation4 + $0x1], 0  ;;  %s492_s9 = smov 0   ;;  %s494_s10 = smov 0  }
   0x4   :  { %s496_s11 = smov 0   ;;  %s498_s12 = smov 0  }
   0x5 LB: > { %s513_s13 = sadd.s32 4294967295, %s471_s12   ;;  %s314_s14 = sadd.s32 4294967294, %s471_s12   ;;  %s471_s12 = sphi %s498_s12, %s677_s12   ;;  %s467_s11 = sphi %s496_s11, %s676_s11   ;;  %s463_s10 = sphi %s494_s10, %s675_s10   ;;  %s459_s9 = sphi %s492_s9, %s674_s9  }
   0x6   : > { %s517_s15 = sadd.s32 1, %s471_s12   ;;  %s25_s16 = sadd.s32 1, %s467_s11 }
   0x7   : > { %s22_s17 = ssub.s32 %s471_s12, %s517_s15  ;;  %p32_p0 = scmp.ne.s32.totalorder %s467_s11, %s463_s10 }
   0x8   : > { %p23_p1 = scmp.eq.s32.totalorder %s22_s17, 0  ;;  %p33_p2 = scmp.eq.s32.totalorder %s471_s12, 0 }
   0x9   : > { %p38_p3 = scmp.ne.s32.totalorder %s463_s10, %s459_s9  ;;  %p39_p4 = scmp.eq.s32.totalorder %s513_s13, 0 }
   0xa   : > { %s529_s18 = scalar_select %p23_p1, %s467_s11, %s25_s16  }
   0xb   : > { %p34_p5 = por %p33_p2, %p32_p0  ;;  %p531_p6 = por %p39_p4, %p38_p3 }
   0xc   : > { %p667_p7 = scmp.eq.s32.totalorder %s513_s13, 1  ;;  %p89_p8 = scmp.eq.s32.totalorder %s314_s14, 1 }
   0xd   : > { %p666_p11 = scmp.ge.s32.totalorder %s471_s12, 2 }
   0xe   : > { %p538_p9 = por %p667_p7, %p32_p0  ;;  %p542_p10 = por %p89_p8, %p38_p3 }
   0xf   : > { %108 = sbr.rel (%p666_p11) target bundleno = 57 (0x39), region = 20 }
  0x10   : > { %s670_s21 = scalar_select %p542_p10, 1, 0 }
  0x16   : > { %111 = sbr.rel (!%p34_p5) target bundleno = 57 (0x39), region = 24  ;;  %s112_s22 = sand.u32 (%p34_p5), 1, %s467_s11  }
  0x17   : > { %s318_s23 = sshll.u32 (%p34_p5), %s471_s12, 1  ;;  %s317_s24 = sshll.u32 (%p34_p5), %s112_s22, 4 }
  0x18   : > { %s118_s25 = ssub.s32 (%p34_p5), 3, %s318_s23  ;;  %s554_s28 = scalar_lea.sflag (%p34_p5), [#allocation3], %s112_s22 }
  0x19   : > { %p119_p12 = scmp.lt.s32.totalorder (%p34_p5), %s118_s25, 2  ;;  %s116_s29 = scalar_lea.vmem (%p34_p5), [#allocation2], %s317_s24 }
  0x1d   : > { %s679_s25 = smov (!%p119_p12, %s118_s25), 2 }
  0x1e   : > { %s551_s26 = sshll.u32 %s679_s25, 7 }
  0x1f   : > { %s123_s27 = ssub.s32 256, %s551_s26 }
  0x20   : > { %124 = vsyncadd %s554_s28, %s123_s27  ;;  %p320_p13 = scmp.ne.s32.totalorder %s551_s26, 0  ;;  %s334_s30 = sshll.u32 %s471_s12, 8 }
  0x21   : > { %s562_s5 = scalar_lea.hbm %s663_s0, %s334_s30  ;;  %s129_s6 = sshll.u32 %s116_s29, 4  ;;  %s564_s6 = int_to_ptr.vmem [resolvable:$true] %s129_s6 }
  0x22   : > { %s377_s7 = scalar_lea.hbm %s562_s5, %s551_s26  ;;  %s381_s16 = scalar_lea.hbm %s663_s0, 384 }
  0x23   : > { %p378_p0 = scmp.ne.s32.totalorder %s562_s5, %s377_s7  ;;  %p382_p3 = scmp.lt.u32.totalorder %s562_s5, %s663_s0 }
  0x24   : > { %p383_p4 = scmp.lt.u32.totalorder %s381_s16, %s377_s7  ;;  %p385_p8 = scmp.lt.u32.totalorder %s377_s7, %s562_s5 }
  0x25   : > { %p379_p1 = pnand %p378_p0, %p320_p13 }
  0x26   : > { %p384_p5 = por %p383_p4, %p382_p3 }
  0x27   : > { %p380_p2 = pneg %p379_p1 }
  0x28   : > { %p386_p12 = por %p385_p8, %p384_p5 }
  0x2a   : > { %p387_p11 = pnand %p386_p12, %p380_p2 }
  0x2c   : > { %390 = shalt.err (!%p387_p11)
}
  0x2d   : > { %s391_s23 = scalar_lea.vmem %s564_s6, %s551_s26  ;;  %s473_s24 = smov [#allocation2]  }
  0x2e   : > { %p392_p0 = scmp.ne.s32.totalorder %s564_s6, %s391_s23  ;;  %s395_s25 = sshll.u32 %s473_s24, 4  ;;  %s396_s25 = int_to_ptr.vmem [resolvable:$false] %s395_s25 }
  0x2f   : > { %s397_s27 = scalar_lea.vmem %s396_s25, 512  ;;  %p398_p10 = scmp.lt.s32.totalorder %s564_s6, %s396_s25 }
  0x30   : > { %p393_p1 = pnand %p392_p0, %p320_p13  ;;  %p399_p3 = scmp.lt.s32.totalorder %s397_s27, %s391_s23 }
  0x32   : > { %p394_p7 = pneg %p393_p1  ;;  %p400_p4 = por %p399_p3, %p398_p10 }
  0x34   : > { %p401_p5 = pnand %p400_p4, %p394_p7 }
  0x36   : > { %404 = shalt.err (!%p401_p5)
}
  0x37   : > { %s474_s29 = smov 128   ;;  %s475_s30 = smov 8  }
  0x38   : > { %135 = dma.hbm_to_vmem [thread:$0]  (%p320_p13), %s562_s5, %s551_s26, %s564_s6, %s554_s28, %s474_s29, %s474_s29, %s475_s30  }
  0x39 PF: > { %p324_p11 = scmp.ge.s32.totalorder %s471_s12, 1  ;;  %p137_p2 = scmp.lt.s32.totalorder %s471_s12, 3 }
  0x3b   : > { %p138_p8 = pnand %p324_p11, %p137_p2 }
  0x3c   : > { %s594_s3 = sand.u32 (!%p138_p8), 1, %s463_s10  }
  0x3d   : > { %141 = sbr.rel (%p138_p8) target bundleno = 129 (0x81), region = 28  ;;  %s325_s4 = sshll.u32 (!%p138_p8), %s594_s3, 4 }
  0x3e   : > { %s144_s7 = scalar_lea.sflag (!%p138_p8), [#allocation3], %s594_s3  ;;  %s598_s8 = scalar_lea.vmem (!%p138_p8), [#allocation2], %s325_s4 }
  0x44   : > { %450 = dma.done.wait (%p531_p6), %s144_s7, 256  }
  0x45   : > { %452 = vsyncadd (%p531_p6), %s144_s7, 4294967040  ;;  %s326_s26 = sshll.u32 %s594_s3, 3  ;;  %s327_s28 = sshll.u32 %s513_s13, 4  ;;  %v173_v0 = vld [vmem:[%s664_s1] sm:$0x1] }
  0x46   : > { %s609_s14 = scalar_lea.vmem [#allocation5], %s326_s26  ;;  %p671_p7 = scmp.eq.s32.totalorder %s513_s13, 1 }
  0x47   : > { %v182_v1 = vlaneseq (!%p671_p7)  ;;  %v179_v4 = vld [vmem:[%s598_s8] sm:$0xff] (!%p671_p7)  ;;  %v180_v5 = vld [vmem:[%s598_s8 + $0x8] sm:$0xff] (!%p671_p7)  ;;  %vm191_vm0 = vcmask (!%p671_p7), 261120  }
  0x48   : > { %178 = sbr.rel (%p671_p7) target bundleno = 87 (0x57), region = 36 }
  0x49   : > { %v183_v2 = vshrl.u32 (!%p671_p7), %v182_v1, 7 }
  0x4b   : > { %v184_v3 = vsub.s32 (!%p671_p7), 0, %v183_v2 }
  0x4d   : > { %v185_v6 = vrot.slane (!%p671_p7), %v173_v0, %v184_v3 }
  0x4f   : > { %v187_v7 = vsub.f32 %v179_v4, %v185_v6  ;;  %v188_v8 = vsub.f32 %v180_v5, %v185_v6 }
  0x51   : > { %v189_v9 = vmul.f32 %v187_v7, %v187_v7  ;;  %v190_v10 = vmul.f32 %v188_v8, %v188_v8 }
  0x53   : > { %v192_v11 = vsel %vm191_vm0, %v189_v9, 0.0  ;;  %v193_v12 = vsel %vm191_vm0, %v190_v10, 0.0 }
  0x54   : > { %v194_v13 = vadd.f32 %v193_v12, %v192_v11 }
  0x56   : > { %196 = vst.msk [vmem:[%s609_s14] sm:$0xff] %vm191_vm0, %v194_v13 }
  0x57 PF: > { %p329_p6 = scmp.ne.s32.totalorder %s513_s13, 1 }
  0x58   : > { %v204_v14 = vlaneseq (!%p329_p6)  ;;  %v217_v16 = vstv (!%p329_p6), %s327_s28  ;;  %v201_v19 = vld [vmem:[%s598_s8] sm:$0xff] (!%p329_p6)  ;;  %v202_v20 = vld [vmem:[%s598_s8 + $0x8] sm:$0xff] (!%p329_p6)  ;;  %vm224_vm3 = vcmask (!%p329_p6), 261120  }
  0x59   : > { %200 = sbr.rel (%p329_p6) target bundleno = 105 (0x69), region = 40 }
  0x5a   : > { %v205_v15 = vshrl.u32 (!%p329_p6), %v204_v14, 7 }
  0x5c   : > { %v206_v17 = vsub.s32 (!%p329_p6), 0, %v205_v15  ;;  %v216_v18 = vadd.s32 (!%p329_p6), 8, %v205_v15  ;;  %v218_v21 = vadd.s32 (!%p329_p6), %v217_v16, %v205_v15 }
  0x5e   : > { %v207_v22 = vrot.slane (!%p329_p6), %v173_v0, %v206_v17  ;;  %v219_v23 = vadd.s32 (!%p329_p6), %v217_v16, %v216_v18  ;;  %vm220_vm1 = vcmp.lt.s32.totalorder (!%p329_p6), %v218_v21, 24 }
  0x60   : > { %v209_v24 = vsub.f32 %v201_v19, %v207_v22  ;;  %v210_v25 = vsub.f32 %v202_v20, %v207_v22  ;;  %vm221_vm2 = vcmp.lt.s32.totalorder %v219_v23, 24 }
  0x62   : > { %v211_v26 = vmul.f32 %v209_v24, %v209_v24  ;;  %v212_v27 = vmul.f32 %v210_v25, %v210_v25 }
  0x64   : > { %v222_v28 = vsel %vm220_vm1, %v211_v26, 0.0  ;;  %v223_v29 = vsel %vm221_vm2, %v212_v27, 0.0 }
  0x65   : > { %v225_v30 = vsel %vm224_vm3, %v222_v28, 0.0  ;;  %v226_v31 = vsel %vm224_vm3, %v223_v29, 0.0 }
  0x66   : > { %v227_v32 = vadd.f32 %v226_v31, %v225_v30 }
  0x68   : > { %229 = vst.msk [vmem:[%s609_s14] sm:$0xff] %vm224_vm3, %v227_v32 }
  0x69 PF: > { %s331_s19 = sshll.u32 %s513_s13, 7  ;;  %s244_s23 = sshll.u32 %s609_s14, 4  ;;  %s245_s23 = int_to_ptr.vmem [resolvable:$true] %s244_s23 }
  0x6a   : > { %s624_s22 = scalar_lea.hbm %s665_s2, %s331_s19  ;;  %s231_s24 = scalar_lea.sflag [#allocation4], %s594_s3 }
  0x6b   : > { %s405_s25 = scalar_lea.vmem %s245_s23, 128  ;;  %s476_s27 = smov [#allocation5]  }
  0x6c   : > { %p406_p10 = scmp.ne.s32.totalorder %s245_s23, %s405_s25  ;;  %s409_s29 = sshll.u32 %s476_s27, 4  ;;  %s410_s29 = int_to_ptr.vmem [resolvable:$false] %s409_s29 }
  0x6d   : > { %s411_s30 = scalar_lea.vmem %s410_s29, 256  ;;  %p412_p0 = scmp.lt.s32.totalorder %s245_s23, %s410_s29 }
  0x6e   : > { %p407_p13 = pnand %p406_p10, %p538_p9  ;;  %p413_p1 = scmp.lt.s32.totalorder %s411_s30, %s405_s25 }
  0x70   : > { %p408_p12 = pneg %p407_p13  ;;  %p414_p3 = por %p413_p1, %p412_p0 }
  0x72   : > { %p415_p4 = pnand %p414_p3, %p408_p12 }
  0x74   : > { %418 = shalt.err (!%p415_p4)
}
  0x75   : > { %s419_s13 = scalar_lea.hbm %s624_s22, 128  ;;  %s423_s7 = scalar_lea.hbm %s665_s2, 256 }
  0x76   : > { %p420_p5 = scmp.ne.s32.totalorder %s624_s22, %s419_s13  ;;  %p424_p8 = scmp.lt.u32.totalorder %s624_s22, %s665_s2 }
  0x77   : > { %p425_p7 = scmp.lt.u32.totalorder %s423_s7, %s419_s13  ;;  %p427_p10 = scmp.lt.u32.totalorder %s419_s13, %s624_s22 }
  0x78   : > { %p421_p11 = pnand %p420_p5, %p538_p9 }
  0x79   : > { %p426_p6 = por %p425_p7, %p424_p8 }
  0x7a   : > { %p422_p2 = pneg %p421_p11 }
  0x7b   : > { %p428_p13 = por %p427_p10, %p426_p6 }
  0x7d   : > { %p429_p12 = pnand %p428_p13, %p422_p2 }
  0x7f   : > { %432 = shalt.err (!%p429_p12)
}
  0x80   : > { %336 = dma.vmem_to_hbm [thread:$0]  (%p538_p9), %s245_s23, 128, %s624_s22, %s231_s24  }
  0x81 PF: > { %s256_s28 = sand.u32 1, %s459_s9   ;;  %p672_p0 = scmp.ne.s32.totalorder %s670_s21, 0 }
  0x82   : > { %p673_p1 = scmp.ge.s32.totalorder %s471_s12, 2  ;;  %s257_s5 = scalar_lea.sflag [#allocation4], %s256_s28 }
  0x84   : > { %p339_p3 = pnand %p673_p1, %p672_p0 }
  0x86   : > { %454 = dma.done.wait (!%p339_p3), %s257_s5, 128  }
  0x87   : > { %456 = vsyncadd (!%p339_p3), %s257_s5, 4294967168  ;;  %p15_p4 = scmp.ge.s32.totalorder %s517_s15, 4   ;;  %s674_s9 = smov %s463_s10 }
  0x88   : > { %s675_s10 = smov %s467_s11  ;;  %s676_s11 = smov %s529_s18 }
  0x89   : > { %s677_s12 = smov %s517_s15  ;;  %17 = sbr.rel (!%p15_p4) target bundleno = 5 (0x5), region = 81 }
  0x90   :  { %262 = vsyncpa [#allocation3], 1 }
  0x91   :  { %264 = vsyncpa [#allocation3 + $0x1], 1 }
  0x92   :  { %265 = vsyncpa [#allocation4], 1 }
  0x93   :  { %267 = vsyncpa [#allocation4 + $0x1], 1 }

</bundles_post_ra>
